<compile_context>
chip_gen: v6e
topology: v6e:2x2x1
jax: 0.10.0
libtpu: 0.0.40
codegen_flags: <defaults>
</compile_context>

<pallas_src>
import jax
import jax.numpy as jnp
from jax.experimental import pallas as pl
from jax.experimental.pallas import tpu as pltpu

LANE = 128
SUBLANE = 8
ROW_TILE_CAP = 1024   # keeps double-buffered VMEM well under v5e's 16 MiB scoped default


def _round_up(x, m):
    return (x + m - 1) // m * m


def _node_update_kernel(
    # activations (row-tiled)
    xv_o_ref, xv_n_ref, xl_o_ref, xl_n_ref,
    # visual-branch params (resident)
    wv1a_ref, wv1b_ref, bv1_ref, wv2_ref, bv2_ref,
    # lang-branch params (resident)
    wl1a_ref, wl1b_ref, bl1_ref, wl2_ref, bl2_ref,
    # outputs (row-tiled)
    ov_ref, ol_ref,
):
    bf16 = jnp.bfloat16

    # ---- visual branch: relu(relu([xo|xn] @ W1 + b1) @ W2 + b2) ----
    # bf16 MXU operands, f32 accumulation; bias add / ReLU in f32 (v5e-safe VPU).
    hv = jnp.dot(xv_o_ref[...].astype(bf16), wv1a_ref[...],
                 preferred_element_type=jnp.float32)
    hv += jnp.dot(xv_n_ref[...].astype(bf16), wv1b_ref[...],
                  preferred_element_type=jnp.float32)
    hv = jnp.maximum(hv + bv1_ref[...], 0.0)
    yv = jnp.dot(hv.astype(bf16), wv2_ref[...],
                 preferred_element_type=jnp.float32)
    yv = jnp.maximum(yv + bv2_ref[...], 0.0)
    ov_ref[...] = yv.astype(ov_ref.dtype)

    # ---- language branch ----
    hl = jnp.dot(xl_o_ref[...].astype(bf16), wl1a_ref[...],
                 preferred_element_type=jnp.float32)
    hl += jnp.dot(xl_n_ref[...].astype(bf16), wl1b_ref[...],
                  preferred_element_type=jnp.float32)
    hl = jnp.maximum(hl + bl1_ref[...], 0.0)
    yl = jnp.dot(hl.astype(bf16), wl2_ref[...],
                 preferred_element_type=jnp.float32)
    yl = jnp.maximum(yl + bl2_ref[...], 0.0)
    ol_ref[...] = yl.astype(ol_ref.dtype)


def prepare_params(params):
    """Split W1 into halves (concat elimination), zero-pad the hidden dim to 128
    lanes, and cast matmul weights to bf16 once (biases stay f32).
    Output dims of W2 are NOT padded: out_specs use the true widths."""
    def pad_cols(w, cols):
        return jnp.pad(w, ((0, 0), (0, cols - w.shape[1])))

    def pad_rows(w, rows):
        return jnp.pad(w, ((0, rows - w.shape[0]), (0, 0)))

    fc_w1, fc_b1 = params["fc_w1"], params["fc_b1"].reshape(1, -1)
    fc_w2, fc_b2 = params["fc_w2"], params["fc_b2"].reshape(1, -1)
    lw1, lb1 = params["fc_lang_w1"], params["fc_lang_b1"].reshape(1, -1)
    lw2, lb2 = params["fc_lang_w2"], params["fc_lang_b2"].reshape(1, -1)

    dv, hv = fc_w1.shape[0] // 2, fc_w1.shape[1]
    dl, hl = lw1.shape[0] // 2, lw1.shape[1]
    hv_p, hl_p = _round_up(hv, LANE), _round_up(hl, LANE)

    bf16 = jnp.bfloat16
    return {
        # visual branch
        "wv1a": pad_cols(fc_w1[:dv], hv_p).astype(bf16),   # (D_vis,  Hv_p)
        "wv1b": pad_cols(fc_w1[dv:], hv_p).astype(bf16),   # (D_vis,  Hv_p)
        "bv1":  pad_cols(fc_b1, hv_p),                     # (1, Hv_p) f32
        "wv2":  pad_rows(fc_w2, hv_p).astype(bf16),        # (Hv_p, D_vis_out)
        "bv2":  fc_b2,                                     # (1, D_vis_out) f32
        # language branch
        "wl1a": pad_cols(lw1[:dl], hl_p).astype(bf16),
        "wl1b": pad_cols(lw1[dl:], hl_p).astype(bf16),
        "bl1":  pad_cols(lb1, hl_p),
        "wl2":  pad_rows(lw2, hl_p).astype(bf16),
        "bl2":  lb2,
    }


def node_update(node_data, prepared):
    """NodeUpdate.forward — returns {'new_n_f': ..., 'new_n_f_lang': ...}."""
    xv_o = node_data["n_f_original"]
    xv_n = node_data["new_n_f"]
    xl_o = node_data["word2vec_original"]
    xl_n = node_data["new_n_f_lang"]

    n = xv_o.shape[0]
    d_vis, d_lang = xv_o.shape[1], xl_o.shape[1]
    hv_p = prepared["wv1a"].shape[1]
    hl_p = prepared["wl1a"].shape[1]
    dvo = prepared["wv2"].shape[1]
    dlo = prepared["wl2"].shape[1]

    # Pad rows only to the f32 sublane (8); the ragged last grid block (if any)
    # is handled by Pallas' masking, so no pad-to-tile pass is needed.
    n_pad = _round_up(n, SUBLANE)
    if n_pad != n:
        pad = lambda x: jnp.pad(x, ((0, n_pad - n), (0, 0)))
        xv_o, xv_n, xl_o, xl_n = pad(xv_o), pad(xv_n), pad(xl_o), pad(xl_n)

    # Adaptive row tile: big enough to amortize ~0.35us/step overhead, gives
    # >=2 grid steps when possible (both v7x TCs busy), capped for v5e VMEM.
    tm = min(_round_up(-(-n_pad // 2), SUBLANE), ROW_TILE_CAP)
    grid = (pl.cdiv(n_pad, tm),)

    row_spec = lambda cols: pl.BlockSpec((tm, cols), lambda i: (i, 0))
    full_spec = lambda arr: pl.BlockSpec(arr.shape, lambda i: (0, 0))

    param_order = ("wv1a", "wv1b", "bv1", "wv2", "bv2",
                   "wl1a", "wl1b", "bl1", "wl2", "bl2")

    in_specs = [
        row_spec(d_vis), row_spec(d_vis), row_spec(d_lang), row_spec(d_lang),
    ] + [full_spec(prepared[k]) for k in param_order]

    # Cost hint so XLA can schedule/overlap this small kernel against neighbors.
    flops = 2 * n_pad * (2 * d_vis * hv_p + hv_p * dvo
                         + 2 * d_lang * hl_p + hl_p * dlo)
    bytes_in = 4 * n_pad * (2 * d_vis + 2 * d_lang)
    bytes_w = sum(int(prepared[k].size) * prepared[k].dtype.itemsize
                  for k in param_order)
    bytes_out = 4 * n_pad * (dvo + dlo)
    cost = pl.CostEstimate(flops=flops, transcendentals=0,
                           bytes_accessed=bytes_in + bytes_w + bytes_out)

    out_v, out_l = pl.pallas_call(
        _node_update_kernel,
        grid=grid,
        in_specs=in_specs,
        out_specs=(
            pl.BlockSpec((tm, dvo), lambda i: (i, 0)),
            pl.BlockSpec((tm, dlo), lambda i: (i, 0)),
        ),
        out_shape=(
            jax.ShapeDtypeStruct((n_pad, dvo), jnp.float32),
            jax.ShapeDtypeStruct((n_pad, dlo), jnp.float32),
        ),
        compiler_params=pltpu.CompilerParams(
            dimension_semantics=("parallel",)),
        cost_estimate=cost,
    )(xv_o, xv_n, xl_o, xl_n, *(prepared[k] for k in param_order))

    if n_pad != n:
        out_v, out_l = out_v[:n], out_l[:n]
    return {"new_n_f": out_v, "new_n_f_lang": out_l}


def _init_params(key, d_vis, h_vis, d_lang, h_lang, dtype=jnp.float32):
    ks = jax.random.split(key, 4)
    scale = 0.05
    return {
        # fc: MLP([2*d_vis, h_vis, d_vis]) with ReLU
        "fc_w1": scale * jax.random.normal(ks[0], (2 * d_vis, h_vis), dtype),
        "fc_b1": jnp.zeros((1, h_vis), dtype),
        "fc_w2": scale * jax.random.normal(ks[1], (h_vis, d_vis), dtype),
        "fc_b2": jnp.zeros((1, d_vis), dtype),
        # fc_lang: MLP([2*d_lang, h_lang, d_lang]) with ReLU
        "fc_lang_w1": scale * jax.random.normal(ks[2], (2 * d_lang, h_lang), dtype),
        "fc_lang_b1": jnp.zeros((1, h_lang), dtype),
        "fc_lang_w2": scale * jax.random.normal(ks[3], (h_lang, d_lang), dtype),
        "fc_lang_b2": jnp.zeros((1, d_lang), dtype),
    }
    # TODO(synk): original MLP optionally inserts BatchNorm / Dropout
    # (CONFIG.G_N_BN_U / G_N_D_U); eval-mode identity is assumed here.


def _reference(node_data, params):
    def ref_mlp(x, w1, b1, w2, b2):
        h = jnp.maximum(x @ w1 + b1, 0.0)
        return jnp.maximum(h @ w2 + b2, 0.0)

    feat = jnp.concatenate(
        [node_data["n_f_original"], node_data["new_n_f"]], axis=1)
    feat_lang = jnp.concatenate(
        [node_data["word2vec_original"], node_data["new_n_f_lang"]], axis=1)
    ref_nf = ref_mlp(feat, params["fc_w1"], params["fc_b1"],
                     params["fc_w2"], params["fc_b2"])
    ref_lang = ref_mlp(feat_lang, params["fc_lang_w1"], params["fc_lang_b1"],
                       params["fc_lang_w2"], params["fc_lang_b2"])
    return ref_nf, ref_lang


if __name__ == "__main__":
    key = jax.random.PRNGKey(0)
    k_data, k_params = jax.random.split(key, 2)

    # Small shapes consistent with the module: N graph nodes, visual feature
    # dim, word2vec dim.
    D_VIS, D_LANG = 32, 16
    H_VIS, H_LANG = 64, 32

    params = _init_params(k_params, D_VIS, H_VIS, D_LANG, H_LANG)
    prepared = prepare_params(params)

    def run_case(n_nodes, seed_key):
        k_nf, k_new, k_w2v, k_newl = jax.random.split(seed_key, 4)
        node_data = {
            "n_f_original":      jax.random.normal(k_nf,   (n_nodes, D_VIS),  jnp.float32),
            "new_n_f":           jax.random.normal(k_new,  (n_nodes, D_VIS),  jnp.float32),
            "word2vec_original": jax.random.normal(k_w2v,  (n_nodes, D_LANG), jnp.float32),
            "new_n_f_lang":      jax.random.normal(k_newl, (n_nodes, D_LANG), jnp.float32),
        }
        out = node_update(node_data, prepared)
        jax.block_until_ready(out)

        ref_nf, ref_lang = _reference(node_data, params)
        assert out["new_n_f"].shape == (n_nodes, D_VIS)
        assert out["new_n_f_lang"].shape == (n_nodes, D_LANG)
        # bf16 MXU operands (f32 accumulation) -> moderate tolerance vs f32 ref.
        assert jnp.allclose(out["new_n_f"], ref_nf, atol=5e-2, rtol=5e-2)
        assert jnp.allclose(out["new_n_f_lang"], ref_lang, atol=5e-2, rtol=5e-2)

    k_a, k_b = jax.random.split(k_data, 2)
    run_case(8, k_a)    # exact tile fit
    run_case(20, k_b)   # exercises sublane padding + ragged last grid block

    print("KERNEL_OK")
</pallas_src>

<mosaic_0001>
module attributes {stable_mosaic.version = 11 : i64} {
  func.func @_node_update_kernel(%arg0: i32, %arg1: memref<8x32xf32, #tpu.memory_space<vmem>>, %arg2: memref<8x32xf32, #tpu.memory_space<vmem>>, %arg3: memref<8x16xf32, #tpu.memory_space<vmem>>, %arg4: memref<8x16xf32, #tpu.memory_space<vmem>>, %arg5: memref<32x128xbf16, #tpu.memory_space<vmem>>, %arg6: memref<32x128xbf16, #tpu.memory_space<vmem>>, %arg7: memref<1x128xf32, #tpu.memory_space<vmem>>, %arg8: memref<128x32xbf16, #tpu.memory_space<vmem>>, %arg9: memref<1x32xf32, #tpu.memory_space<vmem>>, %arg10: memref<16x128xbf16, #tpu.memory_space<vmem>>, %arg11: memref<16x128xbf16, #tpu.memory_space<vmem>>, %arg12: memref<1x128xf32, #tpu.memory_space<vmem>>, %arg13: memref<128x16xbf16, #tpu.memory_space<vmem>>, %arg14: memref<1x16xf32, #tpu.memory_space<vmem>>, %arg15: memref<8x32xf32, #tpu.memory_space<vmem>>, %arg16: memref<8x16xf32, #tpu.memory_space<vmem>>) attributes {dimension_semantics = [#tpu.dimension_semantics<parallel>], iteration_bounds = array<i64: 1>, scalar_prefetch = 0 : i64, scratch_operands = 0 : i64, tpu.core_type = #tpu.core_type<tc>, window_params = [{transform_indices = @transform_0, window_bounds = array<i64: 8, 32>}, {transform_indices = @transform_1, window_bounds = array<i64: 8, 32>}, {transform_indices = @transform_2, window_bounds = array<i64: 8, 16>}, {transform_indices = @transform_3, window_bounds = array<i64: 8, 16>}, {pipeline_mode = #tpu.pipeline_mode<synchronous>, transform_indices = @transform_4, window_bounds = array<i64: 32, 128>}, {pipeline_mode = #tpu.pipeline_mode<synchronous>, transform_indices = @transform_5, window_bounds = array<i64: 32, 128>}, {pipeline_mode = #tpu.pipeline_mode<synchronous>, transform_indices = @transform_6, window_bounds = array<i64: 1, 128>}, {pipeline_mode = #tpu.pipeline_mode<synchronous>, transform_indices = @transform_7, window_bounds = array<i64: 128, 32>}, {pipeline_mode = #tpu.pipeline_mode<synchronous>, transform_indices = @transform_8, window_bounds = array<i64: 1, 32>}, {pipeline_mode = #tpu.pipeline_mode<synchronous>, transform_indices = @transform_9, window_bounds = array<i64: 16, 128>}, {pipeline_mode = #tpu.pipeline_mode<synchronous>, transform_indices = @transform_10, window_bounds = array<i64: 16, 128>}, {pipeline_mode = #tpu.pipeline_mode<synchronous>, transform_indices = @transform_11, window_bounds = array<i64: 1, 128>}, {pipeline_mode = #tpu.pipeline_mode<synchronous>, transform_indices = @transform_12, window_bounds = array<i64: 128, 16>}, {pipeline_mode = #tpu.pipeline_mode<synchronous>, transform_indices = @transform_13, window_bounds = array<i64: 1, 16>}, {transform_indices = @transform_14, window_bounds = array<i64: 8, 32>}, {transform_indices = @transform_15, window_bounds = array<i64: 8, 16>}]} {
    %c0 = arith.constant 0 : index
    %c0_0 = arith.constant 0 : index
    %0 = vector.load %arg1[%c0, %c0_0] : memref<8x32xf32, #tpu.memory_space<vmem>>, vector<8x32xf32>
    %1 = arith.truncf %0 : vector<8x32xf32> to vector<8x32xbf16>
    %c0_1 = arith.constant 0 : index
    %c0_2 = arith.constant 0 : index
    %2 = vector.load %arg5[%c0_1, %c0_2] : memref<32x128xbf16, #tpu.memory_space<vmem>>, vector<32x128xbf16>
    %cst = arith.constant dense<0.000000e+00> : vector<8x128xf32>
    %3 = tpu.matmul %1, %2, %cst {dimension_numbers = #tpu.dot_dimension_numbers<[1], [0], [0], [1], [0, 0, 1, 1], [], []>} : vector<8x32xbf16>, vector<32x128xbf16>, vector<8x128xf32> -> vector<8x128xf32>
    %c0_3 = arith.constant 0 : index
    %c0_4 = arith.constant 0 : index
    %4 = vector.load %arg2[%c0_3, %c0_4] : memref<8x32xf32, #tpu.memory_space<vmem>>, vector<8x32xf32>
    %5 = arith.truncf %4 : vector<8x32xf32> to vector<8x32xbf16>
    %c0_5 = arith.constant 0 : index
    %c0_6 = arith.constant 0 : index
    %6 = vector.load %arg6[%c0_5, %c0_6] : memref<32x128xbf16, #tpu.memory_space<vmem>>, vector<32x128xbf16>
    %cst_7 = arith.constant dense<0.000000e+00> : vector<8x128xf32>
    %7 = tpu.matmul %5, %6, %cst_7 {dimension_numbers = #tpu.dot_dimension_numbers<[1], [0], [0], [1], [0, 0, 1, 1], [], []>} : vector<8x32xbf16>, vector<32x128xbf16>, vector<8x128xf32> -> vector<8x128xf32>
    %8 = arith.addf %3, %7 : vector<8x128xf32>
    %c0_8 = arith.constant 0 : index
    %c0_9 = arith.constant 0 : index
    %9 = vector.load %arg7[%c0_8, %c0_9] : memref<1x128xf32, #tpu.memory_space<vmem>>, vector<1x128xf32>
    %10 = vector.broadcast %9 : vector<1x128xf32> to vector<8x128xf32>
    %11 = arith.addf %8, %10 : vector<8x128xf32>
    %cst_10 = arith.constant 0.000000e+00 : f32
    %12 = vector.broadcast %cst_10 : f32 to vector<8x128xf32>
    %13 = arith.maximumf %11, %12 : vector<8x128xf32>
    %14 = arith.truncf %13 : vector<8x128xf32> to vector<8x128xbf16>
    %c0_11 = arith.constant 0 : index
    %c0_12 = arith.constant 0 : index
    %15 = vector.load %arg8[%c0_11, %c0_12] : memref<128x32xbf16, #tpu.memory_space<vmem>>, vector<128x32xbf16>
    %cst_13 = arith.constant dense<0.000000e+00> : vector<8x32xf32>
    %16 = tpu.matmul %14, %15, %cst_13 {dimension_numbers = #tpu.dot_dimension_numbers<[1], [0], [0], [1], [0, 0, 1, 1], [], []>} : vector<8x128xbf16>, vector<128x32xbf16>, vector<8x32xf32> -> vector<8x32xf32>
    %c0_14 = arith.constant 0 : index
    %c0_15 = arith.constant 0 : index
    %17 = vector.load %arg9[%c0_14, %c0_15] : memref<1x32xf32, #tpu.memory_space<vmem>>, vector<1x32xf32>
    %18 = vector.broadcast %17 : vector<1x32xf32> to vector<8x32xf32>
    %19 = arith.addf %16, %18 : vector<8x32xf32>
    %cst_16 = arith.constant 0.000000e+00 : f32
    %20 = vector.broadcast %cst_16 : f32 to vector<8x32xf32>
    %21 = arith.maximumf %19, %20 : vector<8x32xf32>
    %c0_17 = arith.constant 0 : index
    %c0_18 = arith.constant 0 : index
    %22 = vector.load %arg15[%c0_17, %c0_18] : memref<8x32xf32, #tpu.memory_space<vmem>>, vector<8x32xf32>
    tpu.vector_store %arg15[%c0_17, %c0_18], %21 {strides = array<i32>} : memref<8x32xf32, #tpu.memory_space<vmem>>, vector<8x32xf32>,
    %c0_19 = arith.constant 0 : index
    %c0_20 = arith.constant 0 : index
    %23 = vector.load %arg3[%c0_19, %c0_20] : memref<8x16xf32, #tpu.memory_space<vmem>>, vector<8x16xf32>
    %24 = arith.truncf %23 : vector<8x16xf32> to vector<8x16xbf16>
    %c0_21 = arith.constant 0 : index
    %c0_22 = arith.constant 0 : index
    %25 = vector.load %arg10[%c0_21, %c0_22] : memref<16x128xbf16, #tpu.memory_space<vmem>>, vector<16x128xbf16>
    %cst_23 = arith.constant dense<0.000000e+00> : vector<8x128xf32>
    %26 = tpu.matmul %24, %25, %cst_23 {dimension_numbers = #tpu.dot_dimension_numbers<[1], [0], [0], [1], [0, 0, 1, 1], [], []>} : vector<8x16xbf16>, vector<16x128xbf16>, vector<8x128xf32> -> vector<8x128xf32>
    %c0_24 = arith.constant 0 : index
    %c0_25 = arith.constant 0 : index
    %27 = vector.load %arg4[%c0_24, %c0_25] : memref<8x16xf32, #tpu.memory_space<vmem>>, vector<8x16xf32>
    %28 = arith.truncf %27 : vector<8x16xf32> to vector<8x16xbf16>
    %c0_26 = arith.constant 0 : index
    %c0_27 = arith.constant 0 : index
    %29 = vector.load %arg11[%c0_26, %c0_27] : memref<16x128xbf16, #tpu.memory_space<vmem>>, vector<16x128xbf16>
    %cst_28 = arith.constant dense<0.000000e+00> : vector<8x128xf32>
    %30 = tpu.matmul %28, %29, %cst_28 {dimension_numbers = #tpu.dot_dimension_numbers<[1], [0], [0], [1], [0, 0, 1, 1], [], []>} : vector<8x16xbf16>, vector<16x128xbf16>, vector<8x128xf32> -> vector<8x128xf32>
    %31 = arith.addf %26, %30 : vector<8x128xf32>
    %c0_29 = arith.constant 0 : index
    %c0_30 = arith.constant 0 : index
    %32 = vector.load %arg12[%c0_29, %c0_30] : memref<1x128xf32, #tpu.memory_space<vmem>>, vector<1x128xf32>
    %33 = vector.broadcast %32 : vector<1x128xf32> to vector<8x128xf32>
    %34 = arith.addf %31, %33 : vector<8x128xf32>
    %cst_31 = arith.constant 0.000000e+00 : f32
    %35 = vector.broadcast %cst_31 : f32 to vector<8x128xf32>
    %36 = arith.maximumf %34, %35 : vector<8x128xf32>
    %37 = arith.truncf %36 : vector<8x128xf32> to vector<8x128xbf16>
    %c0_32 = arith.constant 0 : index
    %c0_33 = arith.constant 0 : index
    %38 = vector.load %arg13[%c0_32, %c0_33] : memref<128x16xbf16, #tpu.memory_space<vmem>>, vector<128x16xbf16>
    %cst_34 = arith.constant dense<0.000000e+00> : vector<8x16xf32>
    %39 = tpu.matmul %37, %38, %cst_34 {dimension_numbers = #tpu.dot_dimension_numbers<[1], [0], [0], [1], [0, 0, 1, 1], [], []>} : vector<8x128xbf16>, vector<128x16xbf16>, vector<8x16xf32> -> vector<8x16xf32>
    %c0_35 = arith.constant 0 : index
    %c0_36 = arith.constant 0 : index
    %40 = vector.load %arg14[%c0_35, %c0_36] : memref<1x16xf32, #tpu.memory_space<vmem>>, vector<1x16xf32>
    %41 = vector.broadcast %40 : vector<1x16xf32> to vector<8x16xf32>
    %42 = arith.addf %39, %41 : vector<8x16xf32>
    %cst_37 = arith.constant 0.000000e+00 : f32
    %43 = vector.broadcast %cst_37 : f32 to vector<8x16xf32>
    %44 = arith.maximumf %42, %43 : vector<8x16xf32>
    %c0_38 = arith.constant 0 : index
    %c0_39 = arith.constant 0 : index
    %45 = vector.load %arg16[%c0_38, %c0_39] : memref<8x16xf32, #tpu.memory_space<vmem>>, vector<8x16xf32>
    tpu.vector_store %arg16[%c0_38, %c0_39], %44 {strides = array<i32>} : memref<8x16xf32, #tpu.memory_space<vmem>>, vector<8x16xf32>,
    return
  }
  func.func @transform_0(%arg0: i32) -> (i32, i32) {
    %c0_i32 = arith.constant 0 : i32
    %c0_i32_0 = arith.constant 0 : i32
    return %arg0, %c0_i32 : i32, i32
  }
  func.func @transform_1(%arg0: i32) -> (i32, i32) {
    %c0_i32 = arith.constant 0 : i32
    %c0_i32_0 = arith.constant 0 : i32
    return %arg0, %c0_i32 : i32, i32
  }
  func.func @transform_2(%arg0: i32) -> (i32, i32) {
    %c0_i32 = arith.constant 0 : i32
    %c0_i32_0 = arith.constant 0 : i32
    return %arg0, %c0_i32 : i32, i32
  }
  func.func @transform_3(%arg0: i32) -> (i32, i32) {
    %c0_i32 = arith.constant 0 : i32
    %c0_i32_0 = arith.constant 0 : i32
    return %arg0, %c0_i32 : i32, i32
  }
  func.func @transform_4(%arg0: i32) -> (i32, i32) {
    %c0_i32 = arith.constant 0 : i32
    %c0_i32_0 = arith.constant 0 : i32
    %c0_i32_1 = arith.constant 0 : i32
    return %c0_i32, %c0_i32_0 : i32, i32
  }
  func.func @transform_5(%arg0: i32) -> (i32, i32) {
    %c0_i32 = arith.constant 0 : i32
    %c0_i32_0 = arith.constant 0 : i32
    %c0_i32_1 = arith.constant 0 : i32
    return %c0_i32, %c0_i32_0 : i32, i32
  }
  func.func @transform_6(%arg0: i32) -> (i32, i32) {
    %c0_i32 = arith.constant 0 : i32
    %c0_i32_0 = arith.constant 0 : i32
    %c0_i32_1 = arith.constant 0 : i32
    return %c0_i32, %c0_i32_0 : i32, i32
  }
  func.func @transform_7(%arg0: i32) -> (i32, i32) {
    %c0_i32 = arith.constant 0 : i32
    %c0_i32_0 = arith.constant 0 : i32
    %c0_i32_1 = arith.constant 0 : i32
    return %c0_i32, %c0_i32_0 : i32, i32
  }
  func.func @transform_8(%arg0: i32) -> (i32, i32) {
    %c0_i32 = arith.constant 0 : i32
    %c0_i32_0 = arith.constant 0 : i32
    %c0_i32_1 = arith.constant 0 : i32
    return %c0_i32, %c0_i32_0 : i32, i32
  }
  func.func @transform_9(%arg0: i32) -> (i32, i32) {
    %c0_i32 = arith.constant 0 : i32
    %c0_i32_0 = arith.constant 0 : i32
    %c0_i32_1 = arith.constant 0 : i32
    return %c0_i32, %c0_i32_0 : i32, i32
  }
  func.func @transform_10(%arg0: i32) -> (i32, i32) {
    %c0_i32 = arith.constant 0 : i32
    %c0_i32_0 = arith.constant 0 : i32
    %c0_i32_1 = arith.constant 0 : i32
    return %c0_i32, %c0_i32_0 : i32, i32
  }
  func.func @transform_11(%arg0: i32) -> (i32, i32) {
    %c0_i32 = arith.constant 0 : i32
    %c0_i32_0 = arith.constant 0 : i32
    %c0_i32_1 = arith.constant 0 : i32
    return %c0_i32, %c0_i32_0 : i32, i32
  }
  func.func @transform_12(%arg0: i32) -> (i32, i32) {
    %c0_i32 = arith.constant 0 : i32
    %c0_i32_0 = arith.constant 0 : i32
    %c0_i32_1 = arith.constant 0 : i32
    return %c0_i32, %c0_i32_0 : i32, i32
  }
  func.func @transform_13(%arg0: i32) -> (i32, i32) {
    %c0_i32 = arith.constant 0 : i32
    %c0_i32_0 = arith.constant 0 : i32
    %c0_i32_1 = arith.constant 0 : i32
    return %c0_i32, %c0_i32_0 : i32, i32
  }
  func.func @transform_14(%arg0: i32) -> (i32, i32) {
    %c0_i32 = arith.constant 0 : i32
    %c0_i32_0 = arith.constant 0 : i32
    return %arg0, %c0_i32 : i32, i32
  }
  func.func @transform_15(%arg0: i32) -> (i32, i32) {
    %c0_i32 = arith.constant 0 : i32
    %c0_i32_0 = arith.constant 0 : i32
    return %arg0, %c0_i32 : i32, i32
  }
}

</mosaic_0001>

<bundles_post_ra>
// kernel: tpu_custom_call.1
= control target key start
LH: loop header
LB: loop body
LE: loop exit
PB: predicated region body
PF: predicated region fallthrough
CT: control target
= control target key end

     0   :  { %21 = vsyncpa [#allocation3], 0  ;;  %v752_v1 = vmov 0.0   ;;  %vm753_vm0 = vmmov 0   ;;  %vm312_vm1 = vcmask 130048   ;;  %vm76_vm2 = vcmask 261120   ;;  %s972_s0 = inlined_call_operand.vmem [shape: f32[8,32], index: 0, kind: input, shape index: {}]   ;;  %s973_s1 = inlined_call_operand.vmem [shape: f32[8,32], index: 1, kind: input, shape index: {}]   ;;  %s974_s2 = inlined_call_operand.vmem [shape: f32[8,16], index: 2, kind: input, shape index: {}]   ;;  %s975_s3 = inlined_call_operand.vmem [shape: f32[8,16], index: 3, kind: input, shape index: {}]   ;;  %s976_s4 = inlined_call_operand.vmem [shape: bf16[32,128], index: 4, kind: input, shape index: {}]   ;;  %s977_s5 = inlined_call_operand.vmem [shape: bf16[32,128], index: 5, kind: input, shape index: {}]   ;;  %s978_s6 = inlined_call_operand.vmem [shape: f32[1,128], index: 6, kind: input, shape index: {}]   ;;  %s979_s7 = inlined_call_operand.vmem [shape: bf16[128,32], index: 7, kind: input, shape index: {}]   ;;  %s980_s8 = inlined_call_operand.vmem [shape: f32[1,32], index: 8, kind: input, shape index: {}]   ;;  %s981_s9 = inlined_call_operand.vmem [shape: bf16[16,128], index: 9, kind: input, shape index: {}]   ;;  %s982_s10 = inlined_call_operand.vmem [shape: bf16[16,128], index: 10, kind: input, shape index: {}]   ;;  %s983_s11 = inlined_call_operand.vmem [shape: f32[1,128], index: 11, kind: input, shape index: {}]   ;;  %s984_s12 = inlined_call_operand.vmem [shape: bf16[128,16], index: 12, kind: input, shape index: {}]   ;;  %s985_s13 = inlined_call_operand.vmem [shape: f32[1,16], index: 13, kind: input, shape index: {}]   ;;  %s986_s14 = inlined_call_operand.hbm [shape: f32[8,32], index: 14, kind: output, shape index: {0}]   ;;  %s987_s15 = inlined_call_operand.hbm [shape: f32[8,16], index: 15, kind: output, shape index: {1}]  }
   0x1   :  { %v686_v0 = vld [vmem:[%s977_s5 + $0x8] sm:$0xff]   ;;  %614 = vmatprep.subr.bf16.mxu0 %v752_v1  ;;  %650 = vmatprep.subr.bf16.mxu1 %v752_v1  ;;  %v687_v2 = vld [vmem:[%s982_s10] sm:$0xff]   ;;  %v692_v14 = vld [vmem:[%s984_s12 + $0x38] sm:$0xff]  }
   0x2   :  { %615 = vmatpush3.bf16.msra.mxu0 %v686_v0  ;;  %652 = vmatprep.mubr.msk.bf16.mxu1 %vm753_vm0, %v752_v1  ;;  %v302_v3 = vld [vmem:[%s975_s3] sm:$0xff]  ;;  %v689_v9 = vld [vmem:[%s976_s4 + $0x8] sm:$0xff]   ;;  %v693_v16 = vld [vmem:[%s979_s7 + $0x38] sm:$0xff]  }
   0x3   :  { %651 = vmatpush3.bf16.msra.mxu1 %v687_v2  ;;  %616 = vmatprep.subr.bf16.mxu0 %v752_v1  ;;  %v303_v4 = vpack.c.bf16 %v302_v3, %v302_v3  ;;  %v688_v5 = vld [vmem:[%s977_s5] sm:$0xff]   ;;  %v694_v17 = vld [vmem:[%s984_s12 + $0x30] sm:$0xff]   ;;  %v696_v19 = vld [vmem:[%s984_s12 + $0x28] sm:$0xff]  }
   0x4   :  { %v58_v6 = vld [vmem:[%s973_s1] sm:$0xff]  ;;  %618 = vmatprep.mubr.msk.bf16.mxu0 %vm753_vm0, %v752_v1  ;;  %656 = vmatprep.subr.bf16.mxu1 %v752_v1  ;;  %v695_v18 = vld [vmem:[%s979_s7 + $0x30] sm:$0xff]  }
   0x5   :  { %v59_v7 = vpack.c.bf16 %v58_v6, %v58_v6  ;;  %v690_v8 = vld [vmem:[%s981_s9] sm:$0xff]  }
   0x6   :  { %653 = vmatmul.mubr.msk.bf16.vlgmr.msra.gmra.mxu1 %vm312_vm1, %v303_v4  ;;  %617 = vmatpush3.bf16.msra.mxu0 %v688_v5  ;;  %v298_v10 = vld [vmem:[%s974_s2] sm:$0xff] }
   0x7   :  { %622 = vmatprep.subr.bf16.mxu0 %v752_v1  ;;  %657 = vmatpush3.bf16.msra.mxu1 %v690_v8  ;;  %v691_v11 = vld [vmem:[%s976_s4] sm:$0xff]   ;;  %v299_v12 = vpack.c.bf16 %v298_v10, %v298_v10 }
   0x8   :  { %658 = vmatprep.mubr.msk.bf16.mxu1 %vm753_vm0, %v752_v1  ;;  %662 = vmatprep.subr.bf16.mxu1 %v752_v1  ;;  %v52_v13 = vld [vmem:[%s972_s0] sm:$0xff] }
   0x9   :  { %619 = vmatmul.mubr.msk.bf16.vlgmr.msra.gmra.mxu0 %vm76_vm2, %v59_v7  ;;  %v53_v15 = vpack.c.bf16 %v52_v13, %v52_v13 }
   0xa   :  { %623 = vmatpush3.bf16.msra.mxu0 %v689_v9  ;;  %626 = vmatprep.mubr.msk.bf16.mxu0 %vm753_vm0, %v752_v1 }
   0xb   :  { %624 = vmatprep.subr.bf16.mxu0 %v752_v1 }
   0xe   :  { %659 = vmatmul.mubr.msk.bf16.vlgmr.msra.gmra.mxu1 %vm312_vm1, %v299_v12  ;;  %625 = vmatpush3.bf16.msra.mxu0 %v691_v11 }
   0xf   :  { %663 = vmatpush3.bf16.msra.mxu1 %v692_v14  ;;  %630 = vmatprep.subr.bf16.mxu0 %v752_v1 }
  0x10   :  { %664 = vmatprep.subr.bf16.mxu1 %v752_v1  ;;  %678 = vmatprep.mubr.msk.bf16.mxu1 %vm753_vm0, %v752_v1 }
  0x11   :  { %627 = vmatmul.mubr.msk.bf16.vlgmr.msra.gmra.mxu0 %vm76_vm2, %v53_v15 }
  0x12   :  { %631 = vmatpush3.bf16.msra.mxu0 %v693_v16  ;;  %646 = vmatprep.mubr.msk.bf16.mxu0 %vm753_vm0, %v752_v1 }
  0x13   :  { %665 = vmatpush3.bf16.msra.mxu1 %v694_v17  ;;  %632 = vmatprep.subr.bf16.mxu0 %v752_v1 }
  0x14   :  { %666 = vmatprep.subr.bf16.mxu1 %v752_v1 }
  0x15   :  { %22 = vsyncpa [#allocation5], 0  ;;  %v697_v20 = vld [vmem:[%s979_s7 + $0x28] sm:$0xff]   ;;  %v698_v21 = vld [vmem:[%s984_s12 + $0x20] sm:$0xff]   ;;  %s754_s10 = smov [#allocation4]   ;;  %s755_s28 = smov [#allocation2]  }
  0x16   :  { %633 = vmatpush3.bf16.msra.mxu0 %v695_v18  ;;  %v699_v22 = vld [vmem:[%s979_s7 + $0x20] sm:$0xff]   ;;  %v700_v23 = vld [vmem:[%s984_s12 + $0x18] sm:$0xff]   ;;  %v702_v25 = vld [vmem:[%s984_s12 + $0x10] sm:$0xff]   ;;  %s534_s5 = sshll.u32 %s755_s28, 4  ;;  %s535_s5 = int_to_ptr.vmem [resolvable:$true] %s534_s5 }
  0x17   :  { %667 = vmatpush3.bf16.msra.mxu1 %v696_v19  ;;  %634 = vmatprep.subr.bf16.mxu0 %v752_v1  ;;  %v701_v24 = vld [vmem:[%s979_s7 + $0x18] sm:$0xff]   ;;  %v703_v26 = vld [vmem:[%s979_s7 + $0x10] sm:$0xff]   ;;  %v704_v27 = vld [vmem:[%s984_s12 + $0x8] sm:$0xff]  }
  0x18   :  { %668 = vmatprep.subr.bf16.mxu1 %v752_v1  ;;  %v705_v28 = vld [vmem:[%s979_s7 + $0x8] sm:$0xff]   ;;  %v706_v29 = vld [vmem:[%s984_s12] sm:$0xff]  }
  0x19   :  { %v707_v30 = vld [vmem:[%s979_s7] sm:$0xff]  }
  0x1a   :  { %635 = vmatpush3.bf16.msra.mxu0 %v697_v20  ;;  %v576_v39 = vld [vmem:[%s983_s11] ss:$0 sm:$0xff] }
  0x1b   :  { %669 = vmatpush3.bf16.msra.mxu1 %v698_v21  ;;  %636 = vmatprep.subr.bf16.mxu0 %v752_v1  ;;  %v562_v45 = vld [vmem:[%s978_s6] ss:$0 sm:$0xff]  ;;  %s544_s6 = sshll.u32 %s754_s10, 4  ;;  %s545_s6 = int_to_ptr.vmem [resolvable:$true] %s544_s6 }
  0x1c   :  { %670 = vmatprep.subr.bf16.mxu1 %v752_v1  ;;  %v577_v57 = vld [vmem:[%s985_s13] ss:$0 sm:$0xff]  ;;  %s708_s13 = scalar_lea.vmem %s545_s6, 128  ;;  %p713_p1 = scmp.lt.s32.totalorder %s545_s6, %s545_s6 }
  0x1d   :  { %v563_v60 = vld [vmem:[%s980_s8] ss:$0 sm:$0xff]  ;;  %p709_p0 = scmp.ne.s32.totalorder %s545_s6, %s708_s13  ;;  %p714_p2 = scmp.lt.s32.totalorder %s708_s13, %s708_s13 }
  0x1e   :  { %637 = vmatpush3.bf16.msra.mxu0 %v699_v22 }
  0x1f   :  { %671 = vmatpush3.bf16.msra.mxu1 %v700_v23  ;;  %638 = vmatprep.subr.bf16.mxu0 %v752_v1  ;;  %p715_p3 = por %p714_p2, %p713_p1 }
  0x20   :  { %672 = vmatprep.subr.bf16.mxu1 %v752_v1 }
  0x21   :  { %p716_p4 = pnand %p715_p3, %p709_p0 }
  0x22   :  { %639 = vmatpush3.bf16.msra.mxu0 %v701_v24 }
  0x23   :  { %673 = vmatpush3.bf16.msra.mxu1 %v702_v25  ;;  %640 = vmatprep.subr.bf16.mxu0 %v752_v1 }
  0x24   :  { %674 = vmatprep.subr.bf16.mxu1 %v752_v1 }
  0x26   :  { %641 = vmatpush3.bf16.msra.mxu0 %v703_v26 }
  0x27   :  { %675 = vmatpush3.bf16.msra.mxu1 %v704_v27  ;;  %642 = vmatprep.subr.bf16.mxu0 %v752_v1 }
  0x28   :  { %676 = vmatprep.subr.bf16.mxu1 %v752_v1 }
  0x2a   :  { %643 = vmatpush3.bf16.msra.mxu0 %v705_v28 }
  0x2b   :  { %677 = vmatpush3.bf16.msra.mxu1 %v706_v29  ;;  %644 = vmatprep.subr.bf16.mxu0 %v752_v1 }
  0x2e   :  { %645 = vmatpush3.bf16.msra.mxu0 %v707_v30 }
  0xc6   :  { %v350_v31 = vpop.f32.mrf.mxu1 }
  0xc8   :  { %v654_v32 = vpop.f32.mrf.mxu1 }
  0xc9   :  { %v114_v33 = vpop.f32.mrf.mxu0 }
  0xca   :  { %v353_v34 = vpop.f32.mrf.mxu1 }
  0xcb   :  { %v620_v35 = vpop.f32.mrf.mxu0 }
  0xcc   :  { %v655_v36 = vpop.f32.mrf.mxu1 }
  0xcd   :  { %v117_v37 = vpop.f32.mrf.mxu0 }
  0xce   :  { %v399_v38 = vpop.f32.mrf.mxu1 }
  0xcf   :  { %v400_v40 = vadd.f32 %v399_v38, %v350_v31  ;;  %v621_v41 = vpop.f32.mrf.mxu0 }
  0xd0   :  { %v660_v42 = vpop.f32.mrf.mxu1 }
  0xd1   :  { %v412_v43 = vadd.f32 %v576_v39, %v400_v40  ;;  %v169_v44 = vpop.f32.mrf.mxu0 }
  0xd2   :  { %v170_v46 = vadd.f32 %v169_v44, %v114_v33  ;;  %v402_v47 = vpop.f32.mrf.mxu1 }
  0xd3   :  { %v413_v48 = vmax.f32 %v412_v43, 0.0  ;;  %v628_v49 = vpop.f32.mrf.mxu0 }
  0xd4   :  { %v182_v50 = vadd.f32 %v562_v45, %v170_v46  ;;  %v661_v51 = vpop.f32.mrf.mxu1 }
  0xd5   :  { %v414_v52 = vpack.c.bf16 %v413_v48, %v413_v48  ;;  %v172_v53 = vpop.f32.mrf.mxu0 }
  0xd6   :  { %v183_v54 = vmax.f32 %v182_v50, 0.0 }
  0xd7   :  { %679 = vmatmul.mubr.bf16.vlgmr.msra.gmra.mxu1 %v414_v52  ;;  %v629_v55 = vpop.f32.mrf.mxu0 }
  0xd8   :  { %v184_v56 = vpack.c.bf16 %v183_v54, %v183_v54 }
  0xda   :  { %647 = vmatmul.mubr.bf16.vlgmr.msra.gmra.mxu0 %v184_v56 }
 0x197   :  { %v520_v58 = vpop.f32.mrf.mxu1 }
 0x198   :  { %v521_v59 = vadd.f32 %v577_v57, %v520_v58 }
 0x199   :  { %v680_v61 = vpop.f32.mrf.mxu1 }
 0x19a   :  { %v526_v62 = vmax.f32 %v521_v59, 0.0  ;;  %v290_v63 = vpop.f32.mrf.mxu0 }
 0x19b   :  { %v291_v0 = vadd.f32 %v563_v60, %v290_v63  ;;  %v523_v1 = vpop.f32.mrf.mxu1 }
 0x19c   :  { %527 = vst.msk [vmem:[#allocation4] sm:$0xff] %vm312_vm1, %v526_v62  ;;  %v648_v2 = vpop.f32.mrf.mxu0 }
 0x19d   :  { %v296_v3 = vmax.f32 %v291_v0, 0.0  ;;  %v681_v4 = vpop.f32.mrf.mxu1 }
 0x19e   :  { %719 = shalt.err (!%p716_p4)
}
 0x19f   :  { %547 = dma.vmem_to_hbm [thread:$0]  %s545_s6, 128, %s987_s15, [#allocation5]   ;;  %v293_v5 = vpop.f32.mrf.mxu0  ;;  %297 = vst.msk [vmem:[#allocation2] sm:$0xff] %vm76_vm2, %v296_v3 }
 0x1a0   :  { %s728_s29 = scalar_lea.vmem %s535_s5, 128  ;;  %p733_p6 = scmp.lt.s32.totalorder %s535_s5, %s535_s5 }
 0x1a1   :  { %v649_v6 = vpop.f32.mrf.mxu0  ;;  %p729_p5 = scmp.ne.s32.totalorder %s535_s5, %s728_s29  ;;  %p734_p7 = scmp.lt.s32.totalorder %s728_s29, %s728_s29 }
 0x1a3   :  { %p735_p8 = por %p734_p7, %p733_p6 }
 0x1a5   :  { %p736_p9 = pnand %p735_p8, %p729_p5 }
 0x1a7   :  { %739 = shalt.err (!%p736_p9)
}
 0x1a8   :  { %537 = dma.vmem_to_hbm [thread:$0]  %s535_s5, 128, %s986_s14, [#allocation3]  }
 0x1a9   :  { %748 = dma.done.wait [#allocation3], 128  }
 0x1aa   :  { %749 = vsyncadd [#allocation3], 4294967168 }
 0x1ab   :  { %750 = dma.done.wait [#allocation5], 128  }
 0x1ac   :  { %751 = vsyncadd [#allocation5], 4294967168 }
 0x1ad   :  { %554 = vsyncpa [#allocation3], 1 }
 0x1ae   :  { %555 = vsyncpa [#allocation5], 1 }

</bundles_post_ra>
